<compile_context>
chip_gen: v5e
topology: v5e:2x2
jax: 0.10.0
libtpu: 0.0.40
codegen_flags: <defaults>
</compile_context>

<pallas_src>
import functools

import jax
import jax.numpy as jnp
from jax.experimental import pallas as pl
from jax.experimental.pallas import tpu as pltpu


def mapping_kernel(noise_ref, w_ref, out_ref, *, n_layer: int):
    """Whole mapping network in one kernel invocation.

    noise_ref: (B, H) input latent.
    w_ref:     (n_layer, H_in, H_out) pre-transposed weight stack.
    out_ref:   (B, H) output latent.
    """
    x = noise_ref[...].astype(jnp.float32)

    # Static Python unroll: n_layer is a trace-time constant, so the
    # activation on the last layer is skipped at compile time (no runtime
    # select) and there is exactly one store to out_ref.
    for i in range(n_layer):
        w = w_ref[i]  # (H_in, H_out) — already transposed in the wrapper.
        x = jnp.dot(x, w, preferred_element_type=jnp.float32)
        if i < n_layer - 1:
            # LeakyReLU(0.1)
            x = jnp.where(x > 0.0, x, 0.1 * x)

    out_ref[...] = x.astype(out_ref.dtype)


def mapping_network(noise: jax.Array, weights: jax.Array) -> jax.Array:
    """noise: [B, H], weights: [n_layer, H_out, H_in] (PyTorch Linear layout)."""
    n_layer, H_out, H_in = weights.shape
    assert H_out == H_in, "mapping network layers are square"
    B, H = noise.shape
    assert H == H_in

    # One-time transpose outside the kernel: [n_layer, H_out, H_in] ->
    # [n_layer, H_in, H_out], so the kernel does x @ W_t (== x @ W.T) with
    # no in-kernel transpose ahead of the MXU.
    weights_t = jnp.swapaxes(weights, 1, 2)

    kernel = functools.partial(mapping_kernel, n_layer=n_layer)

    return pl.pallas_call(
        kernel,
        out_shape=jax.ShapeDtypeStruct((B, H), noise.dtype),
        # No grid: single invocation, full arrays resident in VMEM.
        in_specs=[
            pl.BlockSpec(memory_space=pltpu.MemorySpace.VMEM),  # noise
            pl.BlockSpec(memory_space=pltpu.MemorySpace.VMEM),  # weight stack
        ],
        out_specs=pl.BlockSpec(memory_space=pltpu.MemorySpace.VMEM),
    )(noise, weights_t)


def mapping_network_ref(noise: jax.Array, weights: jax.Array) -> jax.Array:
    """Pure-JAX reference mirroring the PyTorch forward pass."""
    x = noise.astype(jnp.float32)
    n_layer = weights.shape[0]
    for i in range(n_layer):
        x = x @ weights[i].T
        if i < n_layer - 1:
            x = jnp.where(x > 0, x, 0.1 * x)
    return x.astype(noise.dtype)


if __name__ == "__main__":
    # Module hyperparameters (synthetic, deterministic init; bias=False default).
    n_layer = 4
    layer_perceptrons = 32  # H
    batch = 8

    key = jax.random.PRNGKey(0)
    k_noise, k_w = jax.random.split(key)

    noise = jax.random.normal(
        k_noise, (batch, layer_perceptrons), dtype=jnp.float32
    )

    # nn.Linear-style init: U(-1/sqrt(in_features), 1/sqrt(in_features)).
    bound = 1.0 / (layer_perceptrons ** 0.5)
    weights = jax.random.uniform(
        k_w,
        (n_layer, layer_perceptrons, layer_perceptrons),
        dtype=jnp.float32,
        minval=-bound,
        maxval=bound,
    )

    out = mapping_network(noise, weights)
    out = jax.block_until_ready(out)

    ref = mapping_network_ref(noise, weights)
    assert out.shape == (batch, layer_perceptrons)
    assert jnp.allclose(out, ref, atol=1e-5, rtol=1e-5)

    print("KERNEL_OK")
</pallas_src>

<mosaic_0001>
module attributes {stable_mosaic.version = 11 : i64} {
  func.func @mapping_kernel(%arg0: memref<8x32xf32, #tpu.memory_space<vmem>>, %arg1: memref<4x32x32xf32, #tpu.memory_space<vmem>>, %arg2: memref<8x32xf32, #tpu.memory_space<vmem>>) attributes {dimension_semantics = [], scalar_prefetch = 0 : i64, scratch_operands = 0 : i64, tpu.core_type = #tpu.core_type<tc>} {
    %c0 = arith.constant 0 : index
    %c0_0 = arith.constant 0 : index
    %0 = vector.load %arg0[%c0, %c0_0] : memref<8x32xf32, #tpu.memory_space<vmem>>, vector<8x32xf32>
    %c0_1 = arith.constant 0 : index
    %c0_2 = arith.constant 0 : index
    %c0_3 = arith.constant 0 : index
    %1 = vector.load %arg1[%c0_1, %c0_2, %c0_3] : memref<4x32x32xf32, #tpu.memory_space<vmem>>, vector<1x32x32xf32>
    %2 = vector.shape_cast %1 : vector<1x32x32xf32> to vector<32x32xf32>
    %cst = arith.constant dense<0.000000e+00> : vector<8x32xf32>
    %3 = tpu.matmul %0, %2, %cst {dimension_numbers = #tpu.dot_dimension_numbers<[1], [0], [0], [1], [0, 0, 1, 1], [], []>} : vector<8x32xf32>, vector<32x32xf32>, vector<8x32xf32> -> vector<8x32xf32>
    %cst_4 = arith.constant 0.000000e+00 : f32
    %4 = vector.broadcast %cst_4 : f32 to vector<8x32xf32>
    %5 = arith.cmpf ogt, %3, %4 : vector<8x32xf32>
    %cst_5 = arith.constant 1.000000e-01 : f32
    %6 = vector.broadcast %cst_5 : f32 to vector<8x32xf32>
    %7 = arith.mulf %6, %3 : vector<8x32xf32>
    %8 = arith.select %5, %3, %7 : vector<8x32xi1>, vector<8x32xf32>
    %c1 = arith.constant 1 : index
    %c0_6 = arith.constant 0 : index
    %c0_7 = arith.constant 0 : index
    %9 = vector.load %arg1[%c1, %c0_6, %c0_7] : memref<4x32x32xf32, #tpu.memory_space<vmem>>, vector<1x32x32xf32>
    %10 = vector.shape_cast %9 : vector<1x32x32xf32> to vector<32x32xf32>
    %cst_8 = arith.constant dense<0.000000e+00> : vector<8x32xf32>
    %11 = tpu.matmul %8, %10, %cst_8 {dimension_numbers = #tpu.dot_dimension_numbers<[1], [0], [0], [1], [0, 0, 1, 1], [], []>} : vector<8x32xf32>, vector<32x32xf32>, vector<8x32xf32> -> vector<8x32xf32>
    %cst_9 = arith.constant 0.000000e+00 : f32
    %12 = vector.broadcast %cst_9 : f32 to vector<8x32xf32>
    %13 = arith.cmpf ogt, %11, %12 : vector<8x32xf32>
    %cst_10 = arith.constant 1.000000e-01 : f32
    %14 = vector.broadcast %cst_10 : f32 to vector<8x32xf32>
    %15 = arith.mulf %14, %11 : vector<8x32xf32>
    %16 = arith.select %13, %11, %15 : vector<8x32xi1>, vector<8x32xf32>
    %c2 = arith.constant 2 : index
    %c0_11 = arith.constant 0 : index
    %c0_12 = arith.constant 0 : index
    %17 = vector.load %arg1[%c2, %c0_11, %c0_12] : memref<4x32x32xf32, #tpu.memory_space<vmem>>, vector<1x32x32xf32>
    %18 = vector.shape_cast %17 : vector<1x32x32xf32> to vector<32x32xf32>
    %cst_13 = arith.constant dense<0.000000e+00> : vector<8x32xf32>
    %19 = tpu.matmul %16, %18, %cst_13 {dimension_numbers = #tpu.dot_dimension_numbers<[1], [0], [0], [1], [0, 0, 1, 1], [], []>} : vector<8x32xf32>, vector<32x32xf32>, vector<8x32xf32> -> vector<8x32xf32>
    %cst_14 = arith.constant 0.000000e+00 : f32
    %20 = vector.broadcast %cst_14 : f32 to vector<8x32xf32>
    %21 = arith.cmpf ogt, %19, %20 : vector<8x32xf32>
    %cst_15 = arith.constant 1.000000e-01 : f32
    %22 = vector.broadcast %cst_15 : f32 to vector<8x32xf32>
    %23 = arith.mulf %22, %19 : vector<8x32xf32>
    %24 = arith.select %21, %19, %23 : vector<8x32xi1>, vector<8x32xf32>
    %c3 = arith.constant 3 : index
    %c0_16 = arith.constant 0 : index
    %c0_17 = arith.constant 0 : index
    %25 = vector.load %arg1[%c3, %c0_16, %c0_17] : memref<4x32x32xf32, #tpu.memory_space<vmem>>, vector<1x32x32xf32>
    %26 = vector.shape_cast %25 : vector<1x32x32xf32> to vector<32x32xf32>
    %cst_18 = arith.constant dense<0.000000e+00> : vector<8x32xf32>
    %27 = tpu.matmul %24, %26, %cst_18 {dimension_numbers = #tpu.dot_dimension_numbers<[1], [0], [0], [1], [0, 0, 1, 1], [], []>} : vector<8x32xf32>, vector<32x32xf32>, vector<8x32xf32> -> vector<8x32xf32>
    %c0_19 = arith.constant 0 : index
    %c0_20 = arith.constant 0 : index
    %28 = vector.load %arg2[%c0_19, %c0_20] : memref<8x32xf32, #tpu.memory_space<vmem>>, vector<8x32xf32>
    tpu.vector_store %arg2[%c0_19, %c0_20], %27 {strides = array<i32>} : memref<8x32xf32, #tpu.memory_space<vmem>>, vector<8x32xf32>,
    return
  }
}

</mosaic_0001>

<bundles_post_ra>
// kernel: tpu_custom_call.1
= control target key start
LH: loop header
LB: loop body
LE: loop exit
PB: predicated region body
PF: predicated region fallthrough
CT: control target
= control target key end

     0   :  { %7 = vsyncpa [#allocation3], 0  ;;  %s304_s0 = inlined_call_operand.hbm [shape: f32[8,32], index: 0, kind: input, shape index: {}]   ;;  %s305_s1 = inlined_call_operand.hbm [shape: f32[4,32,32], index: 1, kind: input, shape index: {}]   ;;  %s306_s2 = inlined_call_operand.hbm [shape: f32[8,32], index: 2, kind: output, shape index: {}]  }
   0x1   :  { %8 = vsyncpa [#allocation6], 0 }
   0x2   :  { %9 = vsyncpa [#allocation4], 0  ;;  %s15_s11 = sshll.u32 %s304_s0, 4  ;;  %s270_s12 = smov [#allocation2]   ;;  %s16_s11 = int_to_ptr.hbm [resolvable:$true] %s15_s11 }
   0x3   :  { %s17_s13 = sshll.u32 %s270_s12, 4  ;;  %s25_s16 = sshll.u32 %s305_s1, 4  ;;  %s18_s13 = int_to_ptr.vmem [resolvable:$true] %s17_s13  ;;  %s26_s16 = int_to_ptr.hbm [resolvable:$true] %s25_s16 }
   0x4   :  { %20 = dma.hbm_to_vmem [thread:$0]  %s16_s11, 128, %s18_s13, [#allocation3]  }
   0x5   :  { %s271_s17 = smov [#allocation5]   ;;  %s272_s19 = smov 128  }
   0x6   :  { %s27_s18 = sshll.u32 %s271_s17, 4  ;;  %s273_s20 = smov 8   ;;  %s28_s18 = int_to_ptr.vmem [resolvable:$true] %s27_s18 }
   0x7   :  { %33 = dma.hbm_to_vmem [thread:$0]  %s26_s16, 2048, %s28_s18, [#allocation6], %s272_s19, %s272_s19, %s273_s20  }
   0x8   :  { %264 = dma.done.wait [#allocation3], 128  }
   0x9   :  { %265 = vsyncadd [#allocation3], 4294967168 }
   0xa   :  { %266 = dma.done.wait [#allocation6], 2048  }
   0xb   :  { %267 = vsyncadd [#allocation6], 4294965248  ;;  %v46_v0 = vld [vmem:[#allocation5 + $0x18] sm:$0xff]  ;;  %v45_v1 = vld [vmem:[#allocation5 + $0x10] sm:$0xff]  ;;  %vm47_vm0 = vcmask 261120   ;;  %s274_s0 = smov [#allocation7]  }
   0xc   :  { %63 = vmatpush.msra.mxu0 %v46_v0  ;;  %v78_v2 = vld [vmem:[#allocation5 + $0x38] sm:$0xff]  ;;  %v44_v3 = vld [vmem:[#allocation5 + $0x8] sm:$0xff]  ;;  %v77_v4 = vld [vmem:[#allocation5 + $0x30] sm:$0xff]  ;;  %s170_s1 = sshll.u32 %s274_s0, 4  ;;  %s172_s23 = sshll.u32 %s306_s2, 4  ;;  %s171_s1 = int_to_ptr.vmem [resolvable:$true] %s170_s1  ;;  %s173_s23 = int_to_ptr.hbm [resolvable:$true] %s172_s23 }
   0xd   :  { %94 = vmatpush.msra.mxu1 %v78_v2  ;;  %v43_v5 = vld [vmem:[#allocation5] sm:$0xff]  ;;  %v42_v6 = vld [vmem:[#allocation2] sm:$0xff]  ;;  %v76_v7 = vld [vmem:[#allocation5 + $0x28] sm:$0xff] }
   0xe   :  { %64 = vmatpush.msra.mxu0 %v45_v1  ;;  %v75_v8 = vld [vmem:[#allocation5 + $0x20] sm:$0xff]  ;;  %v109_v9 = vld [vmem:[#allocation5 + $0x58] sm:$0xff]  ;;  %v108_v10 = vld [vmem:[#allocation5 + $0x50] sm:$0xff] }
   0xf   :  { %95 = vmatpush.msra.mxu1 %v77_v4  ;;  %125 = vmatpush.msra.mxu2 %v109_v9  ;;  %v107_v14 = vld [vmem:[#allocation5 + $0x48] sm:$0xff]  ;;  %v106_v15 = vld [vmem:[#allocation5 + $0x40] sm:$0xff]  ;;  %v140_v16 = vld [vmem:[#allocation5 + $0x78] sm:$0xff] }
  0x10   :  { %65 = vmatpush.msra.mxu0 %v44_v3  ;;  %v139_v17 = vld [vmem:[#allocation5 + $0x70] sm:$0xff]  ;;  %156 = vmatpush.msra.mxu3 %v140_v16  ;;  %v138_v21 = vld [vmem:[#allocation5 + $0x68] sm:$0xff]  ;;  %v137_v22 = vld [vmem:[#allocation5 + $0x60] sm:$0xff] }
  0x11   :  { %96 = vmatpush.msra.mxu1 %v76_v7  ;;  %126 = vmatpush.msra.mxu2 %v108_v10 }
  0x12   :  { %66 = vmatpush.msra.mxu0 %v43_v5  ;;  %157 = vmatpush.msra.mxu3 %v139_v17 }
  0x13   :  { %183 = vmatmul.msk.f32.vlgmr.msra.gmra.mxu0 %vm47_vm0, %v42_v6  ;;  %97 = vmatpush.msra.mxu1 %v75_v8 }
  0x14   :  { %127 = vmatpush.msra.mxu2 %v107_v14  ;;  %158 = vmatpush.msra.mxu3 %v138_v21 }
  0x16   :  { %128 = vmatpush.msra.mxu2 %v106_v15  ;;  %159 = vmatpush.msra.mxu3 %v137_v22 }
  0x90   :  { %v68_v11 = vpop.f32.mrf.mxu0 }
  0x91   :  { %vm71_vm1 = vcmp.gt.f32.partialorder %v68_v11, 0.0  ;;  %v72_v12 = vmul.f32 0.1, %v68_v11 }
  0x93   :  { %v73_v13 = vsel %vm71_vm1, %v68_v11, %v72_v12 }
  0x94   :  { %184 = vmatmul.msk.f32.vlgmr.msra.gmra.mxu1 %vm47_vm0, %v73_v13 }
 0x111   :  { %v99_v18 = vpop.f32.mrf.mxu1 }
 0x112   :  { %vm102_vm2 = vcmp.gt.f32.partialorder %v99_v18, 0.0  ;;  %v103_v19 = vmul.f32 0.1, %v99_v18 }
 0x114   :  { %v104_v20 = vsel %vm102_vm2, %v99_v18, %v103_v19 }
 0x115   :  { %185 = vmatmul.msk.f32.vlgmr.msra.gmra.mxu2 %vm47_vm0, %v104_v20 }
 0x198   :  { %v130_v23 = vpop.f32.mrf.mxu2 }
 0x199   :  { %vm133_vm3 = vcmp.gt.f32.partialorder %v130_v23, 0.0  ;;  %v134_v24 = vmul.f32 0.1, %v130_v23 }
 0x19b   :  { %v135_v25 = vsel %vm133_vm3, %v130_v23, %v134_v24 }
 0x19c   :  { %186 = vmatmul.msk.f32.vlgmr.msra.gmra.mxu3 %vm47_vm0, %v135_v25 }
 0x21f   :  { %v161_v26 = vpop.f32.mrf.mxu3 }
 0x220   :  { %164 = vst.msk [vmem:[#allocation7] sm:$0xff] %vm47_vm0, %v161_v26 }
 0x221   :  { %175 = dma.vmem_to_hbm [thread:$0]  %s171_s1, 128, %s173_s23, [#allocation4]  }
 0x222   :  { %268 = dma.done.wait [#allocation4], 128  }
 0x223   :  { %269 = vsyncadd [#allocation4], 4294967168 }
 0x224   :  { %180 = vsyncpa [#allocation3], 1 }
 0x225   :  { %181 = vsyncpa [#allocation6], 1 }
 0x226   :  { %182 = vsyncpa [#allocation4], 1 }

</bundles_post_ra>
